<compile_context>
chip_gen: v7x
topology: tpu7x:2x2x1
jax: 0.10.0
libtpu: 0.0.40
codegen_flags: <defaults>
</compile_context>

<pallas_src>
import jax
import jax.numpy as jnp
from jax.experimental import pallas as pl
from jax.experimental.pallas import tpu as pltpu

_PREC = jax.lax.Precision.HIGHEST  # exact f32 matmuls; MXU is nowhere near the bottleneck here


def mlp_kernel(xT_ref,
               w1_ref, b1_ref,
               w2_ref, b2_ref,
               w3_ref, b3_ref,
               w4_ref, b4_ref,
               w5_ref, b5_ref,
               o_ref):
    # Activations are (features, tm): features on sublanes, batch on lanes (dense).
    h = xT_ref[...].astype(jnp.float32)                                      # (in_dim, tm)

    h = jnp.tanh(jnp.dot(w1_ref[...], h, preferred_element_type=jnp.float32,
                         precision=_PREC) + b1_ref[...])                     # (32, tm)
    h = jnp.tanh(jnp.dot(w2_ref[...], h, preferred_element_type=jnp.float32,
                         precision=_PREC) + b2_ref[...])                     # (32, tm)
    h = jnp.tanh(jnp.dot(w3_ref[...], h, preferred_element_type=jnp.float32,
                         precision=_PREC) + b3_ref[...])                     # (32, tm)
    h = jnp.tanh(jnp.dot(w4_ref[...], h, preferred_element_type=jnp.float32,
                         precision=_PREC) + b4_ref[...])                     # (16, tm)
    h = jnp.dot(w5_ref[...], h, preferred_element_type=jnp.float32,
                precision=_PREC) + b5_ref[...]                               # (1, tm)

    # Lane-dense store: last dim of the output block is tm (a multiple of 128).
    o_ref[...] = h.astype(o_ref.dtype)


def mlp_forward(x, params, *, tm=512):
    """x: (batch, in_dim) float32. params: list of (W, b) with W stored as (fan_in, fan_out).

    Returns (batch, 1), matching the PyTorch module's forward.
    """
    batch, in_dim = x.shape
    assert tm % 128 == 0, "tm must be a multiple of 128 (lane width)"

    # Pad batch up to a multiple of tm (layout plumbing in the wrapper).
    pad_batch = ((batch + tm - 1) // tm) * tm
    if pad_batch != batch:
        x = jnp.pad(x, ((0, pad_batch - batch), (0, 0)))

    # Batch-on-lanes layout: x^T is (in_dim, pad_batch); weights become (fan_out, fan_in);
    # biases become (fan_out, 1) column vectors that broadcast along the lane axis.
    xT = x.T
    flat = []
    for W, b in params:
        flat.append(W.T)                # (fan_out, fan_in)
        flat.append(b.reshape(-1, 1))   # (fan_out, 1)

    def const_spec(arr):
        # Constant index_map: fetched once, resident in VMEM for the whole grid.
        return pl.BlockSpec(arr.shape, lambda i: (0, 0))

    in_specs = [pl.BlockSpec((in_dim, tm), lambda i: (0, i))]
    in_specs += [const_spec(a) for a in flat]

    out_dim = params[-1][0].shape[1]    # = 1

    outT = pl.pallas_call(
        mlp_kernel,
        out_shape=jax.ShapeDtypeStruct((out_dim, pad_batch), x.dtype),
        grid_spec=pltpu.PrefetchScalarGridSpec(
            num_scalar_prefetch=0,
            grid=(pad_batch // tm,),
            in_specs=in_specs,
            out_specs=pl.BlockSpec((out_dim, tm), lambda i: (0, i)),
        ),
        compiler_params=pltpu.CompilerParams(
            dimension_semantics=("parallel",)),
    )(xT, *flat)

    # Back to PyTorch's (batch, 1) convention; drop any padding rows.
    return outT.T[:batch]


def init_params(key, in_dim):
    """Deterministic init mimicking PyTorch nn.Linear (uniform +-1/sqrt(fan_in))."""
    dims = [(in_dim, 32), (32, 32), (32, 32), (32, 16), (16, 1)]
    params = []
    for (fan_in, fan_out) in dims:
        key, kw, kb = jax.random.split(key, 3)
        bound = 1.0 / (fan_in ** 0.5)
        W = jax.random.uniform(kw, (fan_in, fan_out), jnp.float32, -bound, bound)
        b = jax.random.uniform(kb, (fan_out,), jnp.float32, -bound, bound)
        params.append((W, b))
    return params


def mlp_reference(x, params):
    h = x
    for i, (W, b) in enumerate(params):
        h = jnp.dot(h, W, precision=_PREC) + b
        if i < len(params) - 1:
            h = jnp.tanh(h)
    return h


if __name__ == "__main__":
    key = jax.random.PRNGKey(0)
    key, kx = jax.random.split(key)

    in_dim = 8
    batch = 200   # small, non-multiple-of-128 -> exercises the padding path; tm=128 -> grid of 2
    x = jax.random.normal(kx, (batch, in_dim), jnp.float32)

    params = init_params(key, in_dim)

    out = mlp_forward(x, params, tm=128)
    out = jax.block_until_ready(out)

    ref = mlp_reference(x, params)
    assert out.shape == (batch, 1), out.shape
    max_err = float(jnp.max(jnp.abs(out - ref)))
    assert jnp.allclose(out, ref, atol=1e-4, rtol=1e-4), max_err

    print("KERNEL_OK")
</pallas_src>

<mosaic_0001>
module attributes {stable_mosaic.version = 11 : i64} {
  func.func @mlp_kernel(%arg0: i32, %arg1: memref<8x128xf32, #tpu.memory_space<vmem>>, %arg2: memref<32x8xf32, #tpu.memory_space<vmem>>, %arg3: memref<32x1xf32, #tpu.memory_space<vmem>>, %arg4: memref<32x32xf32, #tpu.memory_space<vmem>>, %arg5: memref<32x1xf32, #tpu.memory_space<vmem>>, %arg6: memref<32x32xf32, #tpu.memory_space<vmem>>, %arg7: memref<32x1xf32, #tpu.memory_space<vmem>>, %arg8: memref<16x32xf32, #tpu.memory_space<vmem>>, %arg9: memref<16x1xf32, #tpu.memory_space<vmem>>, %arg10: memref<1x16xf32, #tpu.memory_space<vmem>>, %arg11: memref<1x1xf32, #tpu.memory_space<vmem>>, %arg12: memref<1x128xf32, #tpu.memory_space<vmem>>) attributes {dimension_semantics = [#tpu.dimension_semantics<parallel>], iteration_bounds = array<i64: 2>, scalar_prefetch = 0 : i64, scratch_operands = 0 : i64, tpu.core_type = #tpu.core_type<tc>, window_params = [{transform_indices = @transform_0, window_bounds = array<i64: 8, 128>}, {pipeline_mode = #tpu.pipeline_mode<synchronous>, transform_indices = @transform_1, window_bounds = array<i64: 32, 8>}, {pipeline_mode = #tpu.pipeline_mode<synchronous>, transform_indices = @transform_2, window_bounds = array<i64: 32, 1>}, {pipeline_mode = #tpu.pipeline_mode<synchronous>, transform_indices = @transform_3, window_bounds = array<i64: 32, 32>}, {pipeline_mode = #tpu.pipeline_mode<synchronous>, transform_indices = @transform_4, window_bounds = array<i64: 32, 1>}, {pipeline_mode = #tpu.pipeline_mode<synchronous>, transform_indices = @transform_5, window_bounds = array<i64: 32, 32>}, {pipeline_mode = #tpu.pipeline_mode<synchronous>, transform_indices = @transform_6, window_bounds = array<i64: 32, 1>}, {pipeline_mode = #tpu.pipeline_mode<synchronous>, transform_indices = @transform_7, window_bounds = array<i64: 16, 32>}, {pipeline_mode = #tpu.pipeline_mode<synchronous>, transform_indices = @transform_8, window_bounds = array<i64: 16, 1>}, {pipeline_mode = #tpu.pipeline_mode<synchronous>, transform_indices = @transform_9, window_bounds = array<i64: 1, 16>}, {pipeline_mode = #tpu.pipeline_mode<synchronous>, transform_indices = @transform_10, window_bounds = array<i64: 1, 1>}, {transform_indices = @transform_11, window_bounds = array<i64: 1, 128>}]} {
    %c0 = arith.constant 0 : index
    %c0_0 = arith.constant 0 : index
    %0 = vector.load %arg1[%c0, %c0_0] : memref<8x128xf32, #tpu.memory_space<vmem>>, vector<8x128xf32>
    %c0_1 = arith.constant 0 : index
    %c0_2 = arith.constant 0 : index
    %1 = vector.load %arg2[%c0_1, %c0_2] : memref<32x8xf32, #tpu.memory_space<vmem>>, vector<32x8xf32>
    %cst = arith.constant dense<0.000000e+00> : vector<32x128xf32>
    %2 = tpu.matmul %1, %0, %cst {dimension_numbers = #tpu.dot_dimension_numbers<[1], [0], [0], [1], [0, 0, 1, 1], [], []>, precision = #tpu.contract_precision<fp32>} : vector<32x8xf32>, vector<8x128xf32>, vector<32x128xf32> -> vector<32x128xf32>
    %c0_3 = arith.constant 0 : index
    %c0_4 = arith.constant 0 : index
    %3 = vector.load %arg3[%c0_3, %c0_4] : memref<32x1xf32, #tpu.memory_space<vmem>>, vector<32x1xf32>
    %4 = vector.broadcast %3 : vector<32x1xf32> to vector<32x128xf32>
    %5 = arith.addf %2, %4 : vector<32x128xf32>
    %6 = math.tanh %5 : vector<32x128xf32>
    %c0_5 = arith.constant 0 : index
    %c0_6 = arith.constant 0 : index
    %7 = vector.load %arg4[%c0_5, %c0_6] : memref<32x32xf32, #tpu.memory_space<vmem>>, vector<32x32xf32>
    %cst_7 = arith.constant dense<0.000000e+00> : vector<32x128xf32>
    %8 = tpu.matmul %7, %6, %cst_7 {dimension_numbers = #tpu.dot_dimension_numbers<[1], [0], [0], [1], [0, 0, 1, 1], [], []>, precision = #tpu.contract_precision<fp32>} : vector<32x32xf32>, vector<32x128xf32>, vector<32x128xf32> -> vector<32x128xf32>
    %c0_8 = arith.constant 0 : index
    %c0_9 = arith.constant 0 : index
    %9 = vector.load %arg5[%c0_8, %c0_9] : memref<32x1xf32, #tpu.memory_space<vmem>>, vector<32x1xf32>
    %10 = vector.broadcast %9 : vector<32x1xf32> to vector<32x128xf32>
    %11 = arith.addf %8, %10 : vector<32x128xf32>
    %12 = math.tanh %11 : vector<32x128xf32>
    %c0_10 = arith.constant 0 : index
    %c0_11 = arith.constant 0 : index
    %13 = vector.load %arg6[%c0_10, %c0_11] : memref<32x32xf32, #tpu.memory_space<vmem>>, vector<32x32xf32>
    %cst_12 = arith.constant dense<0.000000e+00> : vector<32x128xf32>
    %14 = tpu.matmul %13, %12, %cst_12 {dimension_numbers = #tpu.dot_dimension_numbers<[1], [0], [0], [1], [0, 0, 1, 1], [], []>, precision = #tpu.contract_precision<fp32>} : vector<32x32xf32>, vector<32x128xf32>, vector<32x128xf32> -> vector<32x128xf32>
    %c0_13 = arith.constant 0 : index
    %c0_14 = arith.constant 0 : index
    %15 = vector.load %arg7[%c0_13, %c0_14] : memref<32x1xf32, #tpu.memory_space<vmem>>, vector<32x1xf32>
    %16 = vector.broadcast %15 : vector<32x1xf32> to vector<32x128xf32>
    %17 = arith.addf %14, %16 : vector<32x128xf32>
    %18 = math.tanh %17 : vector<32x128xf32>
    %c0_15 = arith.constant 0 : index
    %c0_16 = arith.constant 0 : index
    %19 = vector.load %arg8[%c0_15, %c0_16] : memref<16x32xf32, #tpu.memory_space<vmem>>, vector<16x32xf32>
    %cst_17 = arith.constant dense<0.000000e+00> : vector<16x128xf32>
    %20 = tpu.matmul %19, %18, %cst_17 {dimension_numbers = #tpu.dot_dimension_numbers<[1], [0], [0], [1], [0, 0, 1, 1], [], []>, precision = #tpu.contract_precision<fp32>} : vector<16x32xf32>, vector<32x128xf32>, vector<16x128xf32> -> vector<16x128xf32>
    %c0_18 = arith.constant 0 : index
    %c0_19 = arith.constant 0 : index
    %21 = vector.load %arg9[%c0_18, %c0_19] : memref<16x1xf32, #tpu.memory_space<vmem>>, vector<16x1xf32>
    %22 = vector.broadcast %21 : vector<16x1xf32> to vector<16x128xf32>
    %23 = arith.addf %20, %22 : vector<16x128xf32>
    %24 = math.tanh %23 : vector<16x128xf32>
    %c0_20 = arith.constant 0 : index
    %c0_21 = arith.constant 0 : index
    %25 = vector.load %arg10[%c0_20, %c0_21] : memref<1x16xf32, #tpu.memory_space<vmem>>, vector<1x16xf32>
    %cst_22 = arith.constant dense<0.000000e+00> : vector<1x128xf32>
    %26 = tpu.matmul %25, %24, %cst_22 {dimension_numbers = #tpu.dot_dimension_numbers<[1], [0], [0], [1], [0, 0, 1, 1], [], []>, precision = #tpu.contract_precision<fp32>} : vector<1x16xf32>, vector<16x128xf32>, vector<1x128xf32> -> vector<1x128xf32>
    %c0_23 = arith.constant 0 : index
    %c0_24 = arith.constant 0 : index
    %27 = vector.load %arg11[%c0_23, %c0_24] : memref<1x1xf32, #tpu.memory_space<vmem>>, vector<1x1xf32>
    %28 = vector.broadcast %27 : vector<1x1xf32> to vector<1x128xf32>
    %29 = arith.addf %26, %28 : vector<1x128xf32>
    %c0_25 = arith.constant 0 : index
    %c0_26 = arith.constant 0 : index
    %30 = vector.load %arg12[%c0_25, %c0_26] : memref<1x128xf32, #tpu.memory_space<vmem>>, vector<1x128xf32>
    tpu.vector_store %arg12[%c0_25, %c0_26], %29 {strides = array<i32>} : memref<1x128xf32, #tpu.memory_space<vmem>>, vector<1x128xf32>,
    return
  }
  func.func @transform_0(%arg0: i32) -> (i32, i32) {
    %c0_i32 = arith.constant 0 : i32
    %c0_i32_0 = arith.constant 0 : i32
    return %c0_i32, %arg0 : i32, i32
  }
  func.func @transform_1(%arg0: i32) -> (i32, i32) {
    %c0_i32 = arith.constant 0 : i32
    %c0_i32_0 = arith.constant 0 : i32
    %c0_i32_1 = arith.constant 0 : i32
    return %c0_i32, %c0_i32_0 : i32, i32
  }
  func.func @transform_2(%arg0: i32) -> (i32, i32) {
    %c0_i32 = arith.constant 0 : i32
    %c0_i32_0 = arith.constant 0 : i32
    %c0_i32_1 = arith.constant 0 : i32
    return %c0_i32, %c0_i32_0 : i32, i32
  }
  func.func @transform_3(%arg0: i32) -> (i32, i32) {
    %c0_i32 = arith.constant 0 : i32
    %c0_i32_0 = arith.constant 0 : i32
    %c0_i32_1 = arith.constant 0 : i32
    return %c0_i32, %c0_i32_0 : i32, i32
  }
  func.func @transform_4(%arg0: i32) -> (i32, i32) {
    %c0_i32 = arith.constant 0 : i32
    %c0_i32_0 = arith.constant 0 : i32
    %c0_i32_1 = arith.constant 0 : i32
    return %c0_i32, %c0_i32_0 : i32, i32
  }
  func.func @transform_5(%arg0: i32) -> (i32, i32) {
    %c0_i32 = arith.constant 0 : i32
    %c0_i32_0 = arith.constant 0 : i32
    %c0_i32_1 = arith.constant 0 : i32
    return %c0_i32, %c0_i32_0 : i32, i32
  }
  func.func @transform_6(%arg0: i32) -> (i32, i32) {
    %c0_i32 = arith.constant 0 : i32
    %c0_i32_0 = arith.constant 0 : i32
    %c0_i32_1 = arith.constant 0 : i32
    return %c0_i32, %c0_i32_0 : i32, i32
  }
  func.func @transform_7(%arg0: i32) -> (i32, i32) {
    %c0_i32 = arith.constant 0 : i32
    %c0_i32_0 = arith.constant 0 : i32
    %c0_i32_1 = arith.constant 0 : i32
    return %c0_i32, %c0_i32_0 : i32, i32
  }
  func.func @transform_8(%arg0: i32) -> (i32, i32) {
    %c0_i32 = arith.constant 0 : i32
    %c0_i32_0 = arith.constant 0 : i32
    %c0_i32_1 = arith.constant 0 : i32
    return %c0_i32, %c0_i32_0 : i32, i32
  }
  func.func @transform_9(%arg0: i32) -> (i32, i32) {
    %c0_i32 = arith.constant 0 : i32
    %c0_i32_0 = arith.constant 0 : i32
    %c0_i32_1 = arith.constant 0 : i32
    return %c0_i32, %c0_i32_0 : i32, i32
  }
  func.func @transform_10(%arg0: i32) -> (i32, i32) {
    %c0_i32 = arith.constant 0 : i32
    %c0_i32_0 = arith.constant 0 : i32
    %c0_i32_1 = arith.constant 0 : i32
    return %c0_i32, %c0_i32_0 : i32, i32
  }
  func.func @transform_11(%arg0: i32) -> (i32, i32) {
    %c0_i32 = arith.constant 0 : i32
    %c0_i32_0 = arith.constant 0 : i32
    return %c0_i32, %arg0 : i32, i32
  }
}

</mosaic_0001>

<bundles_post_ra>
// kernel: tpu_custom_call.1
= control target key start
LH: loop header
LB: loop body
LE: loop exit
PB: predicated region body
PF: predicated region fallthrough
CT: control target
= control target key end

     0   :  { %s4764_s0 = inlined_call_operand.vmem [shape: f32[8,256], index: 0, kind: input, shape index: {}]   ;;  %s4765_s1 = inlined_call_operand.vmem [shape: f32[32,8], index: 1, kind: input, shape index: {}]   ;;  %s4766_s2 = inlined_call_operand.vmem [shape: f32[32,1], index: 2, kind: input, shape index: {}]   ;;  %s4767_s3 = inlined_call_operand.vmem [shape: f32[32,32], index: 3, kind: input, shape index: {}]   ;;  %s4768_s4 = inlined_call_operand.vmem [shape: f32[32,1], index: 4, kind: input, shape index: {}]   ;;  %s4769_s5 = inlined_call_operand.vmem [shape: f32[32,32], index: 5, kind: input, shape index: {}]   ;;  %s4770_s6 = inlined_call_operand.vmem [shape: f32[32,1], index: 6, kind: input, shape index: {}]   ;;  %s4771_s7 = inlined_call_operand.vmem [shape: f32[16,32], index: 7, kind: input, shape index: {}]   ;;  %s4772_s8 = inlined_call_operand.vmem [shape: f32[16,1], index: 8, kind: input, shape index: {}]   ;;  %s4773_s9 = inlined_call_operand.vmem [shape: f32[1,16], index: 9, kind: input, shape index: {}]   ;;  %s4774_s10 = inlined_call_operand.<no memory space> [shape: f32[1,1], index: 10, kind: input, shape index: {}]   ;;  %s4775_s11 = inlined_call_operand.hbm [shape: f32[1,256], index: 11, kind: output, shape index: {}]  }
   0x1   :  { %v16_v0 = vstv %s4774_s10 }
   0x2   :  { %17 = vst [vmem:[#allocation2] sm:$0x1] %v16_v0 }
   0x3   :  { %18 = vsyncpa [#allocation4], 0 }
   0x4   :  { %20 = vsyncpa [#allocation4 + $0x1], 0  ;;  %s4388_s19 = smov 0   ;;  %s4390_s20 = smov 0  }
   0x5   :  { %s4392_s21 = smov 0   ;;  %s4394_s22 = smov 0  }
   0x6 LB: > { %s4409_s10 = sadd.s32 4294967295, %s4318_s22   ;;  %s3414_s23 = sadd.s32 4294967294, %s4318_s22   ;;  %s4318_s22 = sphi %s4394_s22, %s4781_s22   ;;  %s4314_s21 = sphi %s4392_s21, %s4780_s21   ;;  %s4310_s20 = sphi %s4390_s20, %s4779_s20   ;;  %s4306_s19 = sphi %s4388_s19, %s4778_s19  }
   0x7   : > { %s4413_s24 = sadd.s32 1, %s4318_s22   ;;  %s269_s25 = sadd.s32 1, %s4314_s21 }
   0x8   : > { %s266_s26 = ssub.s32 %s4318_s22, %s4413_s24  ;;  %p279_p0 = scmp.ne.s32.totalorder %s4314_s21, %s4310_s20 }
   0x9   : > { %p267_p1 = scmp.eq.s32.totalorder %s266_s26, 0  ;;  %p280_p2 = scmp.eq.s32.totalorder %s4409_s10, 1 }
   0xa   : > { %p285_p3 = scmp.ne.s32.totalorder %s4310_s20, %s4306_s19  ;;  %p286_p4 = scmp.eq.s32.totalorder %s3414_s23, 1 }
   0xb   : > { %s4424_s27 = scalar_select %p267_p1, %s4314_s21, %s269_s25  }
   0xc   : > { %p4426_p5 = por %p280_p2, %p279_p0  ;;  %p4430_p6 = por %p286_p4, %p285_p3 }
   0xd   : > { %p3417_p7 = scmp.ge.s32.totalorder %s4318_s22, 1  ;;  %p341_p8 = scmp.lt.s32.totalorder %s4318_s22, 3 }
   0xf   : > { %p342_p9 = pnand %p3417_p7, %p341_p8 }
  0x10   : > { %p379_p10 = scmp.lt.s32.totalorder (!%p342_p9), %s4409_s10, 1  ;;  %v384_v1 = vld [vmem:[%s4765_s1] sm:$0xff] (!%p342_p9)  ;;  %vm412_vm0 = vcmask (!%p342_p9), 64512   ;;  %v385_v2 = vld [vmem:[%s4765_s1 + $0x8] sm:$0xff] (!%p342_p9)  ;;  %v386_v3 = vld [vmem:[%s4765_s1 + $0x10] sm:$0xff] (!%p342_p9)  ;;  %v4320_v8 = vmov (!%p342_p9), 0  }
  0x11   : > { %345 = sbr.rel (%p342_p9) target bundleno = 1394 (0x572), region = 64  ;;  %v414_v4 = vsel (!%p342_p9), %vm412_vm0, %v384_v1, 0  ;;  %v417_v5 = vsel (!%p342_p9), %vm412_vm0, %v385_v2, 0  ;;  %v420_v6 = vsel (!%p342_p9), %vm412_vm0, %v386_v3, 0  ;;  %v387_v7 = vld [vmem:[%s4765_s1 + $0x18] sm:$0xff] (!%p342_p9)  ;;  %4226 = vset.pattern.permute.xlu0 (!%p342_p9), %v4320_v8  ;;  %v388_v9 = vld [vmem:[%s4766_s2] sm:$0xff] (!%p342_p9)  ;;  %4227 = vset.pattern.permute.xlu1 (!%p342_p9), %v4320_v8 }
  0x12   : > { %v4453_v10 = vand.u32 (!%p342_p9), 4294901760, %v414_v4  ;;  %v4455_v11 = vand.u32 (!%p342_p9), 4294901760, %v417_v5  ;;  %v4457_v12 = vand.u32 (!%p342_p9), 4294901760, %v420_v6  ;;  %v423_v13 = vsel (!%p342_p9), %vm412_vm0, %v387_v7, 0  ;;  %394 = vperm.xlu0 (!%p342_p9), %4226, %v388_v9   ;;  %v390_v14 = vld [vmem:[%s4766_s2 + $0x10] sm:$0xff] (!%p342_p9)  ;;  %v389_v16 = vld [vmem:[%s4766_s2 + $0x8] sm:$0xff] (!%p342_p9) }
  0x13   : > { %v4462_v15 = vand.u32 (!%p342_p9), 4294901760, %v423_v13  ;;  %404 = vperm.xlu1 (!%p342_p9), %4227, %v390_v14   ;;  %v391_v20 = vld [vmem:[%s4766_s2 + $0x18] sm:$0xff] (!%p342_p9)  ;;  %v1008_v28 = vld [vmem:[%s4768_s4] sm:$0xff] (!%p342_p9)  ;;  %v1009_v32 = vld [vmem:[%s4768_s4 + $0x8] sm:$0xff] (!%p342_p9)  ;;  %vm1032_vm1 = vcmask (!%p342_p9), 261120   ;;  %vm4322_vm2 = vmmov (!%p342_p9), 0  }
  0x14   : > { %v492_v17 = vsub.f32 (!%p342_p9), %v414_v4, %v4453_v10  ;;  %v502_v18 = vsub.f32 (!%p342_p9), %v417_v5, %v4455_v11  ;;  %v512_v19 = vsub.f32 (!%p342_p9), %v420_v6, %v4457_v12  ;;  %v1010_v40 = vld [vmem:[%s4768_s4 + $0x10] sm:$0xff] (!%p342_p9)  ;;  %v1667_v43 = vld [vmem:[%s4770_s6] sm:$0xff] (!%p342_p9)  ;;  %v1011_v44 = vld [vmem:[%s4768_s4 + $0x18] sm:$0xff] (!%p342_p9)  ;;  %vm2882_vm3 = vcmask (!%p342_p9), 130048   ;;  %s377_s23 = sand.u32 (!%p342_p9), 1, %s4310_s20  }
  0x15   : > { %v522_v21 = vsub.f32 (!%p342_p9), %v423_v13, %v4462_v15  ;;  %v1669_v45 = vld [vmem:[%s4770_s6 + $0x10] sm:$0xff] (!%p342_p9)  ;;  %v1668_v46 = vld [vmem:[%s4770_s6 + $0x8] sm:$0xff] (!%p342_p9)  ;;  %v2323_v47 = vld [vmem:[%s4772_s8] sm:$0xff] (!%p342_p9) }
  0x16   : > { %3620 = vmatprep.mubr.f32.mxu0 (!%p342_p9), %v492_v17  ;;  %v493_v23 = vand.u32 (!%p342_p9), 4294901760, %v492_v17  ;;  %v503_v24 = vand.u32 (!%p342_p9), 4294901760, %v502_v18  ;;  %v513_v25 = vand.u32 (!%p342_p9), 4294901760, %v512_v19  ;;  %399 = vperm.xlu0 (!%p342_p9), %4226, %v389_v16   ;;  %v1670_v48 = vld [vmem:[%s4770_s6 + $0x18] sm:$0xff] (!%p342_p9)  ;;  %v2872_v49 = vld [vmem:[#allocation2] sm:$0x1] (!%p342_p9) }
  0x17   : > { %v523_v27 = vand.u32 (!%p342_p9), 4294901760, %v522_v21  ;;  %409 = vperm.xlu1 (!%p342_p9), %4227, %v391_v20   ;;  %v2324_v50 = vld [vmem:[%s4772_s8 + $0x8] sm:$0xff] (!%p342_p9)  ;;  %v1004_v51 = vld [vmem:[%s4767_s3] sm:$0xff] (!%p342_p9)  ;;  %v1006_v9 = vld [vmem:[%s4767_s3 + $0x10] sm:$0xff] (!%p342_p9) }
  0x18   : > { %s380_s26 = scalar_select %p379_p10, %s4409_s10, 1  ;;  %v494_v29 = vsub.f32 %v492_v17, %v493_v23  ;;  %v504_v30 = vsub.f32 %v502_v18, %v503_v24  ;;  %v514_v31 = vsub.f32 %v512_v19, %v513_v25  ;;  %v1034_v52 = vsel %vm1032_vm1, %v1004_v51, 0  ;;  %v1005_v4 = vld [vmem:[%s4767_s3 + $0x8] sm:$0xff]  ;;  %v1007_v17 = vld [vmem:[%s4767_s3 + $0x18] sm:$0xff] }
  0x19   : > { %v524_v36 = vsub.f32 %v522_v21, %v523_v27  ;;  %v4523_v53 = vand.u32 4294901760, %v1034_v52  ;;  %v1040_v16 = vsel %vm1032_vm1, %v1006_v9, 0 }
  0x1a   : > { %s3418_s15 = sshll.u32 %s380_s26, 3  ;;  %v495_v34 = vand.u32 4294901760, %v494_v29  ;;  %v505_v35 = vand.u32 4294901760, %v504_v30  ;;  %1014 = vperm.xlu0 %4226, %v1008_v28   ;;  %v515_v37 = vand.u32 4294901760, %v514_v31  ;;  %v4545_v20 = vand.u32 4294901760, %v1040_v16  ;;  %s378_s26 = scalar_lea.vmem [#allocation3], %s377_s23 }
  0x1b   : > { %s382_s25 = scalar_lea.vmem %s4764_s0, %s3418_s15  ;;  %1019 = vperm.xlu1 %4227, %v1009_v32   ;;  %v525_v41 = vand.u32 4294901760, %v524_v36  ;;  %v4526_v54 = vsub.f32 %v1034_v52, %v4523_v53  ;;  %s3359_s30 = sshll.u32 %s378_s26, 4  ;;  %s4724_s30 = int_to_ptr.vmem [resolvable:$true] %s3359_s30 }
  0x1c   : > { %v383_v22 = vld [vmem:[%s382_s25] sm:$0xff]  ;;  %3604 = vmatprep.mubr.f32.mxu1 %v495_v34  ;;  %s3419_s25 = sshll.u32 %s4409_s10, 4  ;;  %s3347_s15 = scalar_lea.sflag [#allocation4], %s377_s23 }
  0x1d   : > { %v426_v26 = vand.u32 4294901760, %v383_v22  ;;  %v1116_v55 = vand.u32 4294901760, %v4526_v54  ;;  %s4722_s14 = scalar_lea.hbm %s4775_s11, %s3419_s25  ;;  %s4256_s16 = scalar_lea.vmem %s4724_s30, 16 }
  0x1e   : > { %1024 = vperm.xlu0 %4226, %v1010_v40   ;;  %p4257_p11 = scmp.ne.s32.totalorder %s4724_s30, %s4256_s16  ;;  %s4324_s10 = smov [#allocation3]  }
  0x1f   : > { %v533_v33 = vsub.f32 %v383_v22, %v426_v26  ;;  %3602 = vmatprep.subr.mxu1 %v426_v26  ;;  %1029 = vperm.xlu1 %4227, %v1011_v44   ;;  %v1117_v56 = vsub.f32 %v4526_v54, %v1116_v55  ;;  %s4260_s17 = sshll.u32 %s4324_s10, 4  ;;  %s4261_s17 = int_to_ptr.vmem [resolvable:$false] %s4260_s17 }
  0x20   : > { %3603 = vmatpush3.msra.mxu1 %v426_v26  ;;  %p4258_p12 = pnand %p4257_p11, %p4426_p5  ;;  %s4262_s18 = scalar_lea.vmem %s4261_s17, 32 }
  0x21   : > { %3618 = vmatprep.subr.mxu0 %v533_v33  ;;  %v534_v38 = vand.u32 4294901760, %v533_v33  ;;  %3605 = vmatmul.mubr.f32.vlgmr.msra.gmra.mrb[0].mxu1 %v505_v35  ;;  %v1118_v57 = vand.u32 4294901760, %v1117_v56  ;;  %p4263_p0 = scmp.lt.s32.totalorder %s4724_s30, %s4261_s17  ;;  %p4264_p1 = scmp.lt.s32.totalorder %s4262_s18, %s4256_s16 }
  0x22   : > { %3619 = vmatpush3.msra.mxu0 %v533_v33  ;;  %3607 = vmatprep.mubr.f32.mxu1 %v515_v37  ;;  %p4259_p13 = pneg %p4258_p12 }
  0x23   : > { %3621 = vmatmul.mubr.f32.vlgmr.msra.gmra.mrb[0].mxu0 %v502_v18  ;;  %3626 = vmatprep.subr.mxu0 %v426_v26  ;;  %v535_v39 = vsub.f32 %v533_v33, %v534_v38  ;;  %p4265_p2 = por %p4264_p1, %p4263_p0 }
  0x24   : > { %3623 = vmatprep.mubr.f32.mxu0 %v512_v19  ;;  %3627 = vmatpush3.msra.mxu0 %v426_v26 }
  0x25   : > { %v536_v42 = vand.u32 4294901760, %v535_v39  ;;  %3634 = vmatprep.subr.mxu0 %v534_v38  ;;  %3608 = vmatmul.mubr.f32.gmra.mrb[2].mxu1 %v525_v41  ;;  %p4266_p3 = pnand %p4265_p2, %p4259_p13 }
  0x26   : > { %3612 = vmatprep.mubr.f32.mxu1 %v4453_v10  ;;  %1673 = vperm.xlu0 %4226, %v1667_v43  }
  0x27   : > { %3624 = vmatmul.mubr.f32.gmra.mrb[2].mxu0 %v522_v21  ;;  %3610 = vmatprep.subr.mxu1 %v536_v42  ;;  %v1043_v21 = vsel %vm1032_vm1, %v1007_v17, 0  ;;  %v1665_v17 = vld [vmem:[%s4769_s5 + $0x10] sm:$0xff] }
  0x28   : > { %3628 = vmatprep.mubr.f32.mxu0 %v493_v23  ;;  %3611 = vmatpush3.msra.mxu1 %v536_v42  ;;  %v4551_v23 = vand.u32 4294901760, %v1043_v21 }
  0x29   : > { %3613 = vmatmul.mubr.f32.vlgmr.msra.gmra.mrb[0].mxu1 %v4455_v11  ;;  %1678 = vperm.xlu1 %4227, %v1668_v46  }
  0x2a   : > { %3615 = vmatprep.mubr.f32.mxu1 %v4457_v12  ;;  %1683 = vperm.xlu0 %4226, %v1669_v45   ;;  %v4558_v30 = vsub.f32 %v1043_v21, %v4551_v23 }
  0x2b   : > { %3629 = vmatmul.mubr.f32.vlgmr.msra.gmra.mrb[0].mxu0 %v503_v24  ;;  %v4554_v24 = vsub.f32 %v1040_v16, %v4545_v20 }
  0x2c   : > { %3631 = vmatprep.mubr.f32.mxu0 %v513_v25  ;;  %3635 = vmatpush3.msra.mxu0 %v534_v38  ;;  %v1146_v42 = vand.u32 4294901760, %v4558_v30 }
  0x2d   : > { %3642 = vmatprep.subr.mxu0 %v426_v26  ;;  %3616 = vmatmul.mubr.f32.gmra.mrb[2].mxu1 %v4462_v15  ;;  %v1136_v32 = vand.u32 4294901760, %v4554_v24 }
  0x2e   : > { %2327 = vperm.xlu0 %4226, %v2323_v47   ;;  %1688 = vperm.xlu1 %4227, %v1670_v48  }
  0x2f   : > { %3632 = vmatmul.mubr.f32.gmra.mrb[2].mxu0 %v523_v27  ;;  %3658 = vmatprep.mubr.f32.mxu1 %v1118_v57  ;;  %v1137_v45 = vsub.f32 %v4554_v24, %v1136_v32 }
  0x30   : > { %3636 = vmatprep.mubr.f32.mxu0 %v4453_v10 }
  0x32   : > { %2875 = vperm.xlu0 %4226, %v2872_v49   ;;  %2332 = vperm.xlu1 %4227, %v2324_v50  }
  0x33   : > { %3637 = vmatmul.mubr.f32.vlgmr.msra.gmra.mrb[0].mxu0 %v4455_v11 }
  0x34   : > { %3639 = vmatprep.mubr.f32.mxu0 %v4457_v12  ;;  %3643 = vmatpush3.msra.mxu0 %v426_v26 }
  0x37   : > { %3640 = vmatmul.mubr.f32.gmra.mrb[2].mxu0 %v4462_v15 }
  0x38   : > { %3644 = vmatprep.mubr.f32.mxu0 %v4453_v10 }
  0x3b   : > { %3645 = vmatmul.mubr.f32.vlgmr.msra.gmra.mrb[0].mxu0 %v4455_v11  ;;  %v1037_v11 = vsel %vm1032_vm1, %v1005_v4, 0 }
  0x3c   : > { %3647 = vmatprep.mubr.f32.mxu0 %v4457_v12  ;;  %v4543_v19 = vand.u32 4294901760, %v1037_v11 }
  0x3e   : > { %v4549_v22 = vsub.f32 %v1037_v11, %v4543_v19 }
  0x3f   : > { %3648 = vmatmul.mubr.f32.gmra.mrb[2].mxu0 %v4462_v15 }
  0x40   : > { %v1126_v28 = vand.u32 4294901760, %v4549_v22 }
  0x42   : > { %v1127_v38 = vsub.f32 %v4549_v22, %v1126_v28 }
  0x44   : > { %v1128_v51 = vand.u32 4294901760, %v1127_v38 }
  0x91   : > { %v395_v62 = vpop.permute.xlu0 %394 }
  0x92   : > { %v405_v63 = vpop.permute.xlu1 %404 }
  0x95   : > { %v400_v0 = vpop.permute.xlu0 %399 }
  0x96   : > { %v410_v7 = vpop.permute.xlu1 %409 }
  0x99   : > { %v1015_v11 = vpop.permute.xlu0 %1014 }
  0x9d   : > { %v1025_v21 = vpop.permute.xlu0 %1024 }
  0xfc   : > { %v3614_v58 = vpop.f32.mrb[0].mxu1 }
  0xfd   : > { %v603_v59 = vpop.f32.mrb[1].mxu1  ;;  %v4088_v1 = vadd.f32 %v3614_v58, %v400_v0  ;;  %v1147_v58 = vsub.f32 %v4558_v30, %v1146_v42 }
  0xfe   : > { %v4090_v2 = vadd.f32 %v603_v59, %v395_v62 }
 0x100   : > { %v3617_v60 = vpop.f32.mrb[2].mxu1 }
 0x101   : > { %v615_v61 = vpop.f32.mrb[3].mxu1  ;;  %v4092_v10 = vadd.f32 %v3617_v60, %v410_v7 }
 0x102   : > { %v4094_v12 = vadd.f32 %v615_v61, %v405_v63  ;;  %v1138_v61 = vand.u32 4294901760, %v1137_v45 }
 0x10e   : > { %v3646_v3 = vpop.f32.mrb[0].mxu0 }
 0x10f   : > { %v4089_v5 = vadd.f32 %v4088_v1, %v3646_v3  ;;  %v978_v6 = vpop.f32.mrb[1].mxu0  ;;  %v1148_v3 = vand.u32 4294901760, %v1147_v58 }
 0x110   : > { %v4091_v8 = vadd.f32 %v4090_v2, %v978_v6 }
 0x111   : > { %4228 = vtanh.f32 %v4089_v5 }
 0x112   : > { %4230 = vtanh.f32 %v4091_v8  ;;  %v3649_v13 = vpop.f32.mrb[2].mxu0 }
 0x113   : > { %v4093_v14 = vadd.f32 %v4092_v10, %v3649_v13  ;;  %v990_v15 = vpop.f32.mrb[3].mxu0  ;;  %v1020_v10 = vpop.permute.xlu1 %1019  ;;  %v1664_v13 = vld [vmem:[%s4769_s5 + $0x8] sm:$0xff] }
 0x114   : > { %v4095_v18 = vadd.f32 %v4094_v12, %v990_v15 }
 0x115   : > { %4232 = vtanh.f32 %v4093_v14 }
 0x116   : > { %4234 = vtanh.f32 %v4095_v18  ;;  %v1695_v18 = vsel %vm1032_vm1, %v1664_v13, 0 }
 0x11b   : > { %v4229_v25 = vpop.eup %4228 }
 0x11c   : > { %v4231_v26 = vpop.eup %4230  ;;  %v1049_v27 = vand.u32 4294901760, %v4229_v25 }
 0x11d   : > { %v1046_v29 = vand.u32 4294901760, %v4231_v26 }
 0x11e   : > { %v1163_v31 = vsub.f32 %v4229_v25, %v1049_v27  ;;  %v1666_v25 = vld [vmem:[%s4769_s5 + $0x18] sm:$0xff] }
 0x11f   : > { %v4233_v33 = vpop.eup %4232  ;;  %v4561_v34 = vpack.c.bf16 %v1049_v27, %v1046_v29  ;;  %v1156_v35 = vsub.f32 %v4231_v26, %v1046_v29  ;;  %v4623_v27 = vand.u32 4294901760, %v1695_v18  ;;  %v1701_v29 = vsel %vm1032_vm1, %v1666_v25, 0 }
 0x120   : > { %v4235_v36 = vpop.eup %4234  ;;  %v1055_v37 = vand.u32 4294901760, %v4233_v33  ;;  %v1164_v39 = vand.u32 4294901760, %v1163_v31 }
 0x121   : > { %v1052_v40 = vand.u32 4294901760, %v4235_v36  ;;  %3927 = vmatprep.subr.bf16.mxu1 %v4561_v34  ;;  %v1157_v41 = vand.u32 4294901760, %v1156_v35  ;;  %v3942_v43 = vpack.c.bf16 %v1163_v31, %v1156_v35 }
 0x122   : > { %3929 = vmatpush3.bf16.msra.mxu1 %v4561_v34  ;;  %v1165_v44 = vsub.f32 %v1163_v31, %v1164_v39  ;;  %v1177_v46 = vsub.f32 %v4233_v33, %v1055_v37  ;;  %v4631_v31 = vand.u32 4294901760, %v1701_v29 }
 0x123   : > { %v3930_v47 = vpack.c.bf16 %v1055_v37, %v1052_v40  ;;  %v1158_v48 = vsub.f32 %v1156_v35, %v1157_v41  ;;  %v1170_v49 = vsub.f32 %v4235_v36, %v1052_v40  ;;  %v3958_v50 = vpack.c.bf16 %v1164_v39, %v1157_v41 }
 0x124   : > { %v1166_v52 = vand.u32 4294901760, %v1165_v44  ;;  %v1178_v56 = vand.u32 4294901760, %v1177_v46  ;;  %v4638_v38 = vsub.f32 %v1701_v29, %v4631_v31 }
 0x125   : > { %3931 = vmatprep.subr.bf16.mxu1 %v3930_v47  ;;  %v1159_v57 = vand.u32 4294901760, %v1158_v48  ;;  %v1171_v59 = vand.u32 4294901760, %v1170_v49  ;;  %v3946_v60 = vpack.c.bf16 %v1177_v46, %v1170_v49 }
 0x126   : > { %3933 = vmatpush3.bf16.msra.mxu1 %v3930_v47  ;;  %v1179_v62 = vsub.f32 %v1177_v46, %v1178_v56 }
 0x127   : > { %v3934_v63 = vpack.c.bf16 %v1166_v52, %v1159_v57  ;;  %v1172_v0 = vsub.f32 %v1170_v49, %v1171_v59  ;;  %v3962_v1 = vpack.c.bf16 %v1178_v56, %v1171_v59 }
 0x128   : > { %v1180_v2 = vand.u32 4294901760, %v1179_v62 }
 0x129   : > { %3659 = vmatmul.mubr.f32.vlgmr.msra.gmra.mrb[4].mxu1 %v1128_v51  ;;  %3935 = vmatprep.subr.bf16.mxu1 %v3934_v63  ;;  %v1173_v4 = vand.u32 4294901760, %v1172_v0 }
 0x12a   : > { %3937 = vmatpush3.bf16.msra.mxu1 %v3934_v63  ;;  %3661 = vmatprep.mubr.f32.mxu1 %v1138_v61 }
 0x12b   : > { %v3938_v5 = vpack.c.bf16 %v1180_v2, %v1173_v4 }
 0x12d   : > { %3662 = vmatmul.mubr.f32.gmra.mrb[6].mxu1 %v1148_v3  ;;  %3939 = vmatprep.subr.bf16.mxu1 %v3938_v5 }
 0x12e   : > { %3941 = vmatpush3.bf16.msra.mxu1 %v3938_v5  ;;  %3672 = vmatprep.mubr.f32.mxu1 %v4523_v53 }
 0x12f   : > { %3943 = vmatprep.subr.bf16.mxu1 %v3942_v43 }
 0x131   : > { %3673 = vmatmul.mubr.f32.vlgmr.msra.gmra.mrb[4].mxu1 %v4543_v19 }
 0x132   : > { %3945 = vmatpush3.bf16.msra.mxu1 %v3942_v43  ;;  %3675 = vmatprep.mubr.f32.mxu1 %v4545_v20 }
 0x133   : > { %3947 = vmatprep.subr.bf16.mxu1 %v3946_v60 }
 0x135   : > { %3676 = vmatmul.mubr.f32.gmra.mrb[6].mxu1 %v4551_v23 }
 0x136   : > { %3949 = vmatpush3.bf16.msra.mxu1 %v3946_v60  ;;  %3686 = vmatprep.mubr.f32.mxu1 %v4526_v54  ;;  %v1663_v54 = vld [vmem:[%s4769_s5] sm:$0xff] }
 0x137   : > { %3951 = vmatprep.subr.bf16.mxu1 %v4561_v34 }
 0x139   : > { %3687 = vmatmul.mubr.f32.vlgmr.msra.gmra.mrb[4].mxu1 %v4549_v22 }
 0x13a   : > { %3953 = vmatpush3.bf16.msra.mxu1 %v4561_v34  ;;  %3689 = vmatprep.mubr.f32.mxu1 %v4554_v24  ;;  %v1698_v24 = vsel %vm1032_vm1, %v1665_v17, 0 }
 0x13b   : > { %3955 = vmatprep.subr.bf16.mxu1 %v3930_v47 }
 0x13d   : > { %3690 = vmatmul.mubr.f32.gmra.mrb[6].mxu1 %v4558_v30  ;;  %v4629_v30 = vsub.f32 %v1695_v18, %v4623_v27 }
 0x13e   : > { %3957 = vmatpush3.bf16.msra.mxu1 %v3930_v47  ;;  %3700 = vmatprep.mubr.f32.mxu1 %v1116_v55  ;;  %v1692_v55 = vsel %vm1032_vm1, %v1663_v54, 0 }
 0x13f   : > { %3959 = vmatprep.subr.bf16.mxu1 %v3958_v50  ;;  %v4603_v6 = vand.u32 4294901760, %v1692_v55  ;;  %v1784_v36 = vand.u32 4294901760, %v4629_v30 }
 0x141   : > { %3701 = vmatmul.mubr.f32.vlgmr.msra.gmra.mrb[4].mxu1 %v1126_v28  ;;  %v4606_v7 = vsub.f32 %v1692_v55, %v4603_v6  ;;  %v4625_v28 = vand.u32 4294901760, %v1698_v24  ;;  %v1785_v46 = vsub.f32 %v4629_v30, %v1784_v36 }
 0x142   : > { %3961 = vmatpush3.bf16.msra.mxu1 %v3958_v50  ;;  %3703 = vmatprep.mubr.f32.mxu1 %v1136_v32  ;;  %v1804_v50 = vand.u32 4294901760, %v4638_v38 }
 0x143   : > { %3963 = vmatprep.subr.bf16.mxu1 %v3962_v1  ;;  %v1774_v8 = vand.u32 4294901760, %v4606_v7  ;;  %v4634_v32 = vsub.f32 %v1698_v24, %v4625_v28  ;;  %v1786_v62 = vand.u32 4294901760, %v1785_v46 }
 0x144   : > { %v1805_v2 = vsub.f32 %v4638_v38, %v1804_v50 }
 0x145   : > { %3704 = vmatmul.mubr.f32.gmra.mrb[6].mxu1 %v1146_v42  ;;  %v1794_v40 = vand.u32 4294901760, %v4634_v32 }
 0x146   : > { %3965 = vmatpush3.bf16.msra.mxu1 %v3962_v1  ;;  %3714 = vmatprep.mubr.f32.mxu1 %v4523_v53 }
 0x147   : > { %3967 = vmatprep.subr.bf16.mxu1 %v4561_v34  ;;  %v1795_v56 = vsub.f32 %v4634_v32, %v1794_v40 }
 0x149   : > { %3715 = vmatmul.mubr.f32.vlgmr.msra.gmra.mrb[4].mxu1 %v4543_v19  ;;  %v1796_v5 = vand.u32 4294901760, %v1795_v56 }
 0x14a   : > { %3969 = vmatpush3.bf16.msra.mxu1 %v4561_v34  ;;  %3717 = vmatprep.mubr.f32.mxu1 %v4545_v20 }
 0x14b   : > { %3971 = vmatprep.subr.bf16.mxu1 %v3930_v47 }
 0x14d   : > { %3718 = vmatmul.mubr.f32.gmra.mrb[6].mxu1 %v4551_v23 }
 0x14e   : > { %3973 = vmatpush3.bf16.msra.mxu1 %v3930_v47  ;;  %3728 = vmatprep.mubr.f32.mxu1 %v4523_v53  ;;  %v1775_v53 = vsub.f32 %v4606_v7, %v1774_v8 }
 0x150   : > { %v1776_v9 = vand.u32 4294901760, %v1775_v53 }
 0x151   : > { %3729 = vmatmul.mubr.f32.vlgmr.msra.gmra.mrb[4].mxu1 %v4543_v19  ;;  %v1030_v19 = vpop.permute.xlu1 %1029 }
 0x152   : > { %3731 = vmatprep.mubr.f32.mxu1 %v4545_v20  ;;  %3742 = vmatprep.mubr.f32.mxu0 %v1776_v9 }
 0x155   : > { %3732 = vmatmul.mubr.f32.gmra.mrb[6].mxu1 %v4551_v23  ;;  %v1679_v18 = vpop.permute.xlu1 %1678 }
 0x159   : > { %v1689_v25 = vpop.permute.xlu1 %1688 }
 0x224   : > { %v3730_v12 = vpop.f32.mrb[4].mxu1 }
 0x225   : > { %v4096_v14 = vadd.f32 %v3730_v12, %v1020_v10  ;;  %v1637_v15 = vpop.f32.mrb[5].mxu1 }
 0x226   : > { %v4097_v16 = vadd.f32 %v1637_v15, %v1015_v11  ;;  %v1806_v11 = vand.u32 4294901760, %v1805_v2 }
 0x227   : > { %4236 = vtanh.f32 %v4096_v14 }
 0x228   : > { %4238 = vtanh.f32 %v4097_v16  ;;  %v3733_v20 = vpop.f32.mrb[6].mxu1 }
 0x229   : > { %v4098_v22 = vadd.f32 %v3733_v20, %v1030_v19  ;;  %v1649_v23 = vpop.f32.mrb[7].mxu1  ;;  %v1674_v19 = vpop.permute.xlu0 %1673 }
 0x22a   : > { %v4099_v26 = vadd.f32 %v1649_v23, %v1025_v21  ;;  %v2322_v23 = vld [vmem:[%s4771_s7 + $0x8] sm:$0xff] }
 0x22b   : > { %4240 = vtanh.f32 %v4098_v22 }
 0x22c   : > { %4242 = vtanh.f32 %v4099_v26 }
 0x231   : > { %v4237_v33 = vpop.eup %4236 }
 0x232   : > { %v4239_v34 = vpop.eup %4238  ;;  %v1707_v35 = vand.u32 4294901760, %v4237_v33 }
 0x233   : > { %v1704_v37 = vand.u32 4294901760, %v4239_v34 }
 0x234   : > { %v1821_v39 = vsub.f32 %v4237_v33, %v1707_v35 }
 0x235   : > { %v4241_v41 = vpop.eup %4240  ;;  %v4641_v42 = vpack.c.bf16 %v1707_v35, %v1704_v37  ;;  %v1814_v43 = vsub.f32 %v4239_v34, %v1704_v37 }
 0x236   : > { %v4243_v44 = vpop.eup %4242  ;;  %v1713_v45 = vand.u32 4294901760, %v4241_v41  ;;  %v1822_v47 = vand.u32 4294901760, %v1821_v39 }
 0x237   : > { %v1710_v48 = vand.u32 4294901760, %v4243_v44  ;;  %3975 = vmatprep.subr.bf16.mxu0 %v4641_v42  ;;  %v1815_v49 = vand.u32 4294901760, %v1814_v43  ;;  %v3990_v51 = vpack.c.bf16 %v1821_v39, %v1814_v43 }
 0x238   : > { %3977 = vmatpush3.bf16.msra.mxu0 %v4641_v42  ;;  %v1823_v52 = vsub.f32 %v1821_v39, %v1822_v47  ;;  %v1835_v57 = vsub.f32 %v4241_v41, %v1713_v45 }
 0x239   : > { %v3978_v58 = vpack.c.bf16 %v1713_v45, %v1710_v48  ;;  %v1816_v59 = vsub.f32 %v1814_v43, %v1815_v49  ;;  %v1828_v60 = vsub.f32 %v4243_v44, %v1710_v48  ;;  %v4006_v61 = vpack.c.bf16 %v1822_v47, %v1815_v49 }
 0x23a   : > { %v1824_v63 = vand.u32 4294901760, %v1823_v52  ;;  %v1836_v0 = vand.u32 4294901760, %v1835_v57 }
 0x23b   : > { %3979 = vmatprep.subr.bf16.mxu0 %v3978_v58  ;;  %v1817_v1 = vand.u32 4294901760, %v1816_v59  ;;  %v1829_v3 = vand.u32 4294901760, %v1828_v60  ;;  %v3994_v4 = vpack.c.bf16 %v1835_v57, %v1828_v60 }
 0x23c   : > { %3981 = vmatpush3.bf16.msra.mxu0 %v3978_v58  ;;  %v1837_v54 = vsub.f32 %v1835_v57, %v1836_v0 }
 0x23d   : > { %v3982_v55 = vpack.c.bf16 %v1824_v63, %v1817_v1  ;;  %v1830_v53 = vsub.f32 %v1828_v60, %v1829_v3  ;;  %v4010_v9 = vpack.c.bf16 %v1836_v0, %v1829_v3 }
 0x23e   : > { %v1838_v10 = vand.u32 4294901760, %v1837_v54 }
 0x23f   : > { %3743 = vmatmul.mubr.f32.vlgmr.msra.gmra.mrb[4].mxu0 %v1786_v62  ;;  %3983 = vmatprep.subr.bf16.mxu0 %v3982_v55  ;;  %v1831_v12 = vand.u32 4294901760, %v1830_v53  ;;  %v4321_v53 = vmov 0.0|0.0  }
 0x240   : > { %3985 = vmatpush3.bf16.msra.mxu0 %v3982_v55  ;;  %3745 = vmatprep.mubr.f32.mxu0 %v1796_v5 }
 0x241   : > { %v3986_v13 = vpack.c.bf16 %v1838_v10, %v1831_v12  ;;  %v2871_v10 = vld [vmem:[%s4773_s9] sm:$0x1]  ;;  %v2333_v12 = vpop.permute.xlu1 %2332 }
 0x243   : > { %3746 = vmatmul.mubr.f32.gmra.mrb[6].mxu0 %v1806_v11  ;;  %3987 = vmatprep.subr.bf16.mxu0 %v3986_v13  ;;  %v2884_v11 = vsel %vm2882_vm3, %v2871_v10, 0 }
 0x244   : > { %3989 = vmatpush3.bf16.msra.mxu0 %v3986_v13  ;;  %3756 = vmatprep.mubr.f32.mxu0 %v4603_v6 }
 0x245   : > { %3991 = vmatprep.subr.bf16.mxu0 %v3990_v51 }
 0x247   : > { %3757 = vmatmul.mubr.f32.vlgmr.msra.gmra.mrb[4].mxu0 %v4623_v27 }
 0x248   : > { %3993 = vmatpush3.bf16.msra.mxu0 %v3990_v51  ;;  %3759 = vmatprep.mubr.f32.mxu0 %v4625_v28 }
 0x249   : > { %3995 = vmatprep.subr.bf16.mxu0 %v3994_v4 }
 0x24b   : > { %3760 = vmatmul.mubr.f32.gmra.mrb[6].mxu0 %v4631_v31 }
 0x24c   : > { %3997 = vmatpush3.bf16.msra.mxu0 %v3994_v4  ;;  %3770 = vmatprep.mubr.f32.mxu0 %v4606_v7  ;;  %v2321_v7 = vld [vmem:[%s4771_s7] sm:$0xff] }
 0x24d   : > { %3999 = vmatprep.subr.bf16.mxu0 %v4641_v42 }
 0x24f   : > { %3771 = vmatmul.mubr.f32.vlgmr.msra.gmra.mrb[4].mxu0 %v4629_v30 }
 0x250   : > { %4001 = vmatpush3.bf16.msra.mxu0 %v4641_v42  ;;  %3773 = vmatprep.mubr.f32.mxu0 %v4634_v32 }
 0x251   : > { %4003 = vmatprep.subr.bf16.mxu0 %v3978_v58 }
 0x253   : > { %3774 = vmatmul.mubr.f32.gmra.mrb[6].mxu0 %v4638_v38 }
 0x254   : > { %4005 = vmatpush3.bf16.msra.mxu0 %v3978_v58  ;;  %3784 = vmatprep.mubr.f32.mxu0 %v1774_v8  ;;  %v2336_v8 = vsel %vm1032_vm1, %v2321_v7, 0 }
 0x255   : > { %4007 = vmatprep.subr.bf16.mxu0 %v4006_v61  ;;  %v4683_v14 = vand.u32 4294901760, %v2336_v8 }
 0x257   : > { %3785 = vmatmul.mubr.f32.vlgmr.msra.gmra.mrb[4].mxu0 %v1784_v36  ;;  %v4686_v15 = vsub.f32 %v2336_v8, %v4683_v14 }
 0x258   : > { %4009 = vmatpush3.bf16.msra.mxu0 %v4006_v61  ;;  %3787 = vmatprep.mubr.f32.mxu0 %v1794_v40 }
 0x259   : > { %4011 = vmatprep.subr.bf16.mxu0 %v4010_v9  ;;  %v2412_v16 = vand.u32 4294901760, %v4686_v15 }
 0x25b   : > { %3788 = vmatmul.mubr.f32.gmra.mrb[6].mxu0 %v1804_v50 }
 0x25c   : > { %4013 = vmatpush3.bf16.msra.mxu0 %v4010_v9  ;;  %3798 = vmatprep.mubr.f32.mxu0 %v4603_v6  ;;  %v4323_v9 = vmov 0.0  }
 0x25d   : > { %4015 = vmatprep.subr.bf16.mxu0 %v4641_v42 }
 0x25f   : > { %3799 = vmatmul.mubr.f32.vlgmr.msra.gmra.mrb[4].mxu0 %v4623_v27 }
 0x260   : > { %4017 = vmatpush3.bf16.msra.mxu0 %v4641_v42  ;;  %3801 = vmatprep.mubr.f32.mxu0 %v4625_v28 }
 0x261   : > { %4019 = vmatprep.subr.bf16.mxu0 %v3978_v58 }
 0x263   : > { %3802 = vmatmul.mubr.f32.gmra.mrb[6].mxu0 %v4631_v31 }
 0x264   : > { %4021 = vmatpush3.bf16.msra.mxu0 %v3978_v58  ;;  %3812 = vmatprep.mubr.f32.mxu0 %v4603_v6  ;;  %v2413_v6 = vsub.f32 %v4686_v15, %v2412_v16 }
 0x265   : > { %4070 = vmatprep.subr.bf16.mxu0 %v4321_v53 }
 0x266   : > { %v2414_v17 = vand.u32 4294901760, %v2413_v6 }
 0x267   : > { %3813 = vmatmul.mubr.f32.vlgmr.msra.gmra.mrb[4].mxu0 %v4623_v27  ;;  %v2339_v27 = vsel %vm1032_vm1, %v2322_v23, 0 }
 0x268   : > { %3815 = vmatprep.mubr.f32.mxu0 %v4625_v28  ;;  %3826 = vmatprep.mubr.f32.mxu1 %v2414_v17  ;;  %v1684_v28 = vpop.permute.xlu0 %1683  ;;  %v4696_v32 = vand.u32 4294901760, %v2339_v27 }
 0x26a   : > { %v2421_v33 = vsub.f32 %v2339_v27, %v4696_v32 }
 0x26b   : > { %3816 = vmatmul.mubr.f32.gmra.mrb[6].mxu0 %v4631_v31 }
 0x26c   : > { %v2422_v38 = vand.u32 4294901760, %v2421_v33  ;;  %3888 = vmatprep.mubr.msk.f32.mxu0 %vm4322_vm2, %v4323_v9  ;;  %v2328_v7 = vpop.permute.xlu0 %2327 }
 0x26e   : > { %v2423_v47 = vsub.f32 %v2421_v33, %v2422_v38 }
 0x270   : > { %v2424_v61 = vand.u32 4294901760, %v2423_v47 }
 0x33a   : > { %v3814_v20 = vpop.f32.mrb[4].mxu0 }
 0x33b   : > { %v4100_v21 = vadd.f32 %v3814_v20, %v1679_v18  ;;  %v2295_v22 = vpop.f32.mrb[5].mxu0 }
 0x33c   : > { %v4101_v24 = vadd.f32 %v2295_v22, %v1674_v19 }
 0x33d   : > { %4244 = vtanh.f32 %v4100_v21 }
 0x33e   : > { %4246 = vtanh.f32 %v4101_v24  ;;  %v3817_v26 = vpop.f32.mrb[6].mxu0 }
 0x33f   : > { %v4102_v29 = vadd.f32 %v3817_v26, %v1689_v25  ;;  %v2307_v30 = vpop.f32.mrb[7].mxu0 }
 0x340   : > { %v4103_v31 = vadd.f32 %v2307_v30, %v1684_v28 }
 0x341   : > { %4248 = vtanh.f32 %v4102_v29 }
 0x342   : > { %4250 = vtanh.f32 %v4103_v31 }
 0x347   : > { %v4245_v34 = vpop.eup %4244 }
 0x348   : > { %v4247_v35 = vpop.eup %4246  ;;  %v2345_v36 = vand.u32 4294901760, %v4245_v34 }
 0x349   : > { %v2342_v37 = vand.u32 4294901760, %v4247_v35 }
 0x34a   : > { %v2439_v39 = vsub.f32 %v4245_v34, %v2345_v36 }
 0x34b   : > { %v4249_v40 = vpop.eup %4248  ;;  %v4022_v41 = vpack.c.bf16 %v2345_v36, %v2342_v37  ;;  %v2432_v42 = vsub.f32 %v4247_v35, %v2342_v37  ;;  %v2878_v36 = vlaneseq }
 0x34c   : > { %v4251_v43 = vpop.eup %4250  ;;  %v2351_v44 = vand.u32 4294901760, %v4249_v40  ;;  %v2440_v45 = vand.u32 4294901760, %v2439_v39 }
 0x34d   : > { %v2348_v46 = vand.u32 4294901760, %v4251_v43  ;;  %4023 = vmatprep.subr.bf16.mxu1 %v4022_v41  ;;  %v2433_v48 = vand.u32 4294901760, %v2432_v42  ;;  %v4038_v49 = vpack.c.bf16 %v2439_v39, %v2432_v42  ;;  %v2879_v37 = vshrl.u32 %v2878_v36, 7 }
 0x34e   : > { %4025 = vmatpush3.bf16.msra.mxu1 %v4022_v41  ;;  %v2441_v50 = vsub.f32 %v2439_v39, %v2440_v45  ;;  %v2453_v51 = vsub.f32 %v4249_v40, %v2351_v44  ;;  %v2876_v39 = vpop.permute.xlu0 %2875 }
 0x34f   : > { %v4026_v52 = vpack.c.bf16 %v2351_v44, %v2348_v46  ;;  %v2434_v56 = vsub.f32 %v2432_v42, %v2433_v48  ;;  %v2446_v57 = vsub.f32 %v4251_v43, %v2348_v46  ;;  %v4054_v58 = vpack.c.bf16 %v2440_v45, %v2433_v48 }
 0x350   : > { %v2442_v59 = vand.u32 4294901760, %v2441_v50  ;;  %v2454_v60 = vand.u32 4294901760, %v2453_v51 }
 0x351   : > { %4027 = vmatprep.subr.bf16.mxu1 %v4026_v52  ;;  %v2435_v62 = vand.u32 4294901760, %v2434_v56  ;;  %v2447_v63 = vand.u32 4294901760, %v2446_v57  ;;  %v4042_v0 = vpack.c.bf16 %v2453_v51, %v2446_v57 }
 0x352   : > { %4029 = vmatpush3.bf16.msra.mxu1 %v4026_v52  ;;  %v2455_v1 = vsub.f32 %v2453_v51, %v2454_v60 }
 0x353   : > { %v4030_v2 = vpack.c.bf16 %v2442_v59, %v2435_v62  ;;  %v2448_v3 = vsub.f32 %v2446_v57, %v2447_v63  ;;  %v4058_v4 = vpack.c.bf16 %v2454_v60, %v2447_v63 }
 0x354   : > { %v2456_v5 = vand.u32 4294901760, %v2455_v1 }
 0x355   : > { %3827 = vmatmul.mubr.f32.vlgmr.msra.gmra.mrb[8].mxu1 %v2424_v61  ;;  %4031 = vmatprep.subr.bf16.mxu1 %v4030_v2  ;;  %v2449_v54 = vand.u32 4294901760, %v2448_v3 }
 0x356   : > { %4033 = vmatpush3.bf16.msra.mxu1 %v4030_v2  ;;  %3837 = vmatprep.mubr.f32.mxu1 %v4683_v14 }
 0x357   : > { %v4034_v55 = vpack.c.bf16 %v2456_v5, %v2449_v54 }
 0x359   : > { %4035 = vmatprep.subr.bf16.mxu1 %v4034_v55 }
 0x35a   : > { %4037 = vmatpush3.bf16.msra.mxu1 %v4034_v55 }
 0x35b   : > { %4039 = vmatprep.subr.bf16.mxu1 %v4038_v49 }
 0x35d   : > { %3838 = vmatmul.mubr.f32.vlgmr.msra.gmra.mrb[8].mxu1 %v4696_v32 }
 0x35e   : > { %4041 = vmatpush3.bf16.msra.mxu1 %v4038_v49  ;;  %3848 = vmatprep.mubr.f32.mxu1 %v4686_v15 }
 0x35f   : > { %4043 = vmatprep.subr.bf16.mxu1 %v4042_v0 }
 0x362   : > { %4045 = vmatpush3.bf16.msra.mxu1 %v4042_v0 }
 0x363   : > { %4047 = vmatprep.subr.bf16.mxu1 %v4022_v41 }
 0x365   : > { %3849 = vmatmul.mubr.f32.vlgmr.msra.gmra.mrb[8].mxu1 %v2421_v33 }
 0x366   : > { %4049 = vmatpush3.bf16.msra.mxu1 %v4022_v41  ;;  %3859 = vmatprep.mubr.f32.mxu1 %v2412_v16  ;;  %v2953_v16 = vand.u32 4294901760, %v2884_v11 }
 0x367   : > { %4051 = vmatprep.subr.bf16.mxu1 %v4026_v52 }
 0x368   : > { %v2954_v6 = vsub.f32 %v2884_v11, %v2953_v16 }
 0x36a   : > { %4053 = vmatpush3.bf16.msra.mxu1 %v4026_v52  ;;  %v2955_v17 = vand.u32 4294901760, %v2954_v6 }
 0x36b   : > { %4055 = vmatprep.subr.bf16.mxu1 %v4054_v58 }
 0x36c   : > { %v2956_v21 = vsub.f32 %v2954_v6, %v2955_v17 }
 0x36d   : > { %3860 = vmatmul.mubr.f32.vlgmr.msra.gmra.mrb[8].mxu1 %v2422_v38  ;;  %v2880_v38 = vsub.s32 0, %v2879_v37 }
 0x36e   : > { %4057 = vmatpush3.bf16.msra.mxu1 %v4054_v58  ;;  %3870 = vmatprep.mubr.f32.mxu1 %v4683_v14  ;;  %v2957_v26 = vand.u32 4294901760, %v2956_v21 }
 0x36f   : > { %4059 = vmatprep.subr.bf16.mxu1 %v4058_v4  ;;  %v2881_v40 = vrot.slane %v2876_v39, %v2880_v38 }
 0x372   : > { %4061 = vmatpush3.bf16.msra.mxu1 %v4058_v4 }
 0x373   : > { %4063 = vmatprep.subr.bf16.mxu1 %v4022_v41 }
 0x375   : > { %3871 = vmatmul.mubr.f32.vlgmr.msra.gmra.mrb[8].mxu1 %v4696_v32 }
 0x376   : > { %4065 = vmatpush3.bf16.msra.mxu1 %v4022_v41  ;;  %3881 = vmatprep.mubr.f32.mxu1 %v4683_v14 }
 0x377   : > { %4067 = vmatprep.subr.bf16.mxu1 %v4026_v52 }
 0x37a   : > { %4069 = vmatpush3.bf16.msra.mxu1 %v4026_v52 }
 0x37d   : > { %3882 = vmatmul.mubr.f32.vlgmr.msra.gmra.mrb[8].mxu1 %v4696_v32 }
 0x450   : > { %v3883_v13 = vpop.f32.mrb[8].mxu1 }
 0x451   : > { %v4104_v8 = vadd.f32 %v3883_v13, %v2333_v12  ;;  %v2859_v14 = vpop.f32.mrb[9].mxu1 }
 0x452   : > { %v4105_v15 = vadd.f32 %v2859_v14, %v2328_v7 }
 0x453   : > { %4252 = vtanh.f32 %v4104_v8 }
 0x454   : > { %4254 = vtanh.f32 %v4105_v15 }
 0x45d   : > { %v4253_v18 = vpop.eup %4252 }
 0x45e   : > { %v4255_v19 = vpop.eup %4254  ;;  %v2890_v20 = vand.u32 4294901760, %v4253_v18 }
 0x45f   : > { %v2887_v22 = vand.u32 4294901760, %v4255_v19 }
 0x460   : > { %v2972_v23 = vsub.f32 %v4253_v18, %v2890_v20 }
 0x461   : > { %v4071_v24 = vpack.c.bf16 %v2890_v20, %v2887_v22  ;;  %v2965_v25 = vsub.f32 %v4255_v19, %v2887_v22 }
 0x462   : > { %v2973_v27 = vand.u32 4294901760, %v2972_v23 }
 0x463   : > { %4072 = vmatpush3.bf16.msra.mxu0 %v4071_v24  ;;  %v2966_v28 = vand.u32 4294901760, %v2965_v25  ;;  %v4077_v29 = vpack.c.bf16 %v2972_v23, %v2965_v25 }
 0x464   : > { %4073 = vmatprep.subr.bf16.mxu0 %v4321_v53  ;;  %v2974_v30 = vsub.f32 %v2972_v23, %v2973_v27 }
 0x465   : > { %v2967_v31 = vsub.f32 %v2965_v25, %v2966_v28  ;;  %v4083_v32 = vpack.c.bf16 %v2973_v27, %v2966_v28 }
 0x466   : > { %3889 = vmatmul.mubr.f32.vlgmr.msra.gmra.mrb[8].mxu0 %v2957_v26  ;;  %v2975_v33 = vand.u32 4294901760, %v2974_v30 }
 0x467   : > { %v2968_v34 = vand.u32 4294901760, %v2967_v31  ;;  %3895 = vmatprep.mubr.msk.f32.mxu0 %vm4322_vm2, %v4323_v9 }
 0x469   : > { %v4074_v35 = vpack.c.bf16 %v2975_v33, %v2968_v34 }
 0x46b   : > { %4075 = vmatpush3.bf16.msra.mxu0 %v4074_v35 }
 0x46c   : > { %4076 = vmatprep.subr.bf16.mxu0 %v4321_v53 }
 0x46e   : > { %3896 = vmatmul.mubr.f32.vlgmr.msra.gmra.mrb[8].mxu0 %v2953_v16 }
 0x46f   : > { %4078 = vmatpush3.bf16.msra.mxu0 %v4077_v29  ;;  %3902 = vmatprep.mubr.msk.f32.mxu0 %vm4322_vm2, %v4323_v9 }
 0x470   : > { %4079 = vmatprep.subr.bf16.mxu0 %v4321_v53 }
 0x476   : > { %3903 = vmatmul.mubr.f32.vlgmr.msra.gmra.mrb[8].mxu0 %v2954_v6 }
 0x477   : > { %4081 = vmatpush3.bf16.msra.mxu0 %v4071_v24  ;;  %3909 = vmatprep.mubr.msk.f32.mxu0 %vm4322_vm2, %v4323_v9 }
 0x478   : > { %4082 = vmatprep.subr.bf16.mxu0 %v4321_v53 }
 0x47e   : > { %3910 = vmatmul.mubr.f32.vlgmr.msra.gmra.mrb[8].mxu0 %v2955_v17 }
 0x47f   : > { %4084 = vmatpush3.bf16.msra.mxu0 %v4083_v32  ;;  %3916 = vmatprep.mubr.msk.f32.mxu0 %vm4322_vm2, %v4323_v9 }
 0x480   : > { %4085 = vmatprep.subr.bf16.mxu0 %v4321_v53 }
 0x486   : > { %3917 = vmatmul.mubr.f32.vlgmr.msra.gmra.mrb[8].mxu0 %v2953_v16 }
 0x487   : > { %4087 = vmatpush3.bf16.msra.mxu0 %v4071_v24  ;;  %3923 = vmatprep.mubr.msk.f32.mxu0 %vm4322_vm2, %v4323_v9 }
 0x48e   : > { %3924 = vmatmul.mubr.f32.vlgmr.msra.gmra.mrb[8].mxu0 %v2953_v16 }
 0x561   : > { %v3341_v41 = vpop.f32.mrb[8].mxu0 }
 0x562   : > { %v4106_v42 = vadd.f32 %v3341_v41, %v2881_v40  ;;  %v3925_v43 = vpop.f32.mrb[9].mxu0 }
 0x564   : > { %3345 = vst [vmem:[%s378_s26] sm:$0x1] %v4106_v42 }
 0x565   : > { %4269 = shalt.err (!%p4266_p3)
}
 0x566   : > { %s4270_s23 = scalar_lea.hbm %s4722_s14, 16  ;;  %s4274_s12 = scalar_lea.hbm %s4775_s11, 32 }
 0x567   : > { %p4271_p4 = scmp.ne.s32.totalorder %s4722_s14, %s4270_s23  ;;  %p4275_p9 = scmp.lt.u32.totalorder %s4722_s14, %s4775_s11 }
 0x568   : > { %p4276_p10 = scmp.lt.u32.totalorder %s4274_s12, %s4270_s23  ;;  %p4278_p12 = scmp.lt.u32.totalorder %s4270_s23, %s4722_s14 }
 0x569   : > { %p4272_p7 = pnand %p4271_p4, %p4426_p5 }
 0x56a   : > { %p4277_p11 = por %p4276_p10, %p4275_p9 }
 0x56b   : > { %p4273_p8 = pneg %p4272_p7 }
 0x56c   : > { %p4279_p13 = por %p4278_p12, %p4277_p11 }
 0x56e   : > { %p4280_p0 = pnand %p4279_p13, %p4273_p8 }
 0x570   : > { %4283 = shalt.err (!%p4280_p0)
}
 0x571   : > { %4183 = dma.vmem_to_hbm [thread:$0]  (%p4426_p5), %s4724_s30, 16, %s4722_s14, %s3347_s15  }
 0x572 PF: > { %p4189_p1 = scmp.ge.s32.totalorder %s4318_s22, 2  ;;  %s3371_s16 = sand.u32 1, %s4306_s19  }
 0x573   : > { %s3372_s17 = scalar_lea.sflag [#allocation4], %s3371_s16 }
 0x574   : > { %p4186_p2 = pnand %p4189_p1, %p4430_p6 }
 0x576   : > { %4301 = dma.done.wait (!%p4186_p2), %s3372_s17, 16  }
 0x577   : > { %4303 = vsyncadd (!%p4186_p2), %s3372_s17, 4294967280  ;;  %p23_p3 = scmp.ge.s32.totalorder %s4413_s24, 4   ;;  %s4778_s19 = smov %s4310_s20 }
 0x578   : > { %s4779_s20 = smov %s4314_s21  ;;  %s4780_s21 = smov %s4424_s27 }
 0x579   : > { %s4781_s22 = smov %s4413_s24  ;;  %25 = sbr.rel (!%p23_p3) target bundleno = 6 (0x6), region = 99 }
 0x580   :  { %3376 = vsyncpa [#allocation4], 1 }
 0x581   :  { %3378 = vsyncpa [#allocation4 + $0x1], 1 }

</bundles_post_ra>
